<compile_context>
chip_gen: v7x
topology: tpu7x:2x2x1
jax: 0.10.0
libtpu: 0.0.40
codegen_flags: <defaults>
</compile_context>

<pallas_src>
import functools

import jax
import jax.numpy as jnp
from jax.experimental import pallas as pl
from jax.experimental.pallas import tpu as pltpu


def _row_tile(m):
    for t in (512, 256, 128, 64, 32, 16, 8):
        if m % t == 0:
            return t
    return m  # full-extent block (always legal)


def _col_tile(n):
    if n <= 1024:
        return n
    for t in (1024, 512, 256, 128):
        if n % t == 0:
            return t
    return n


# ---------------- standalone LayerNorm (generic PreNorm path) ---------------

def _layernorm_kernel(x_ref, g_ref, b_ref, o_ref, *, eps):
    x = x_ref[...].astype(jnp.float32)
    mu = jnp.mean(x, axis=-1, keepdims=True)
    var = jnp.mean(jnp.square(x - mu), axis=-1, keepdims=True)
    y = (x - mu) * jax.lax.rsqrt(var + eps) * g_ref[...] + b_ref[...]
    o_ref[...] = y.astype(o_ref.dtype)


def pallas_layernorm(x, gamma, beta, eps=1e-5):
    """LayerNorm over the last dim.  x: (M, D)."""
    M, D = x.shape
    tm = _row_tile(M)
    g2 = gamma.reshape(1, D).astype(jnp.float32)
    b2 = beta.reshape(1, D).astype(jnp.float32)
    return pl.pallas_call(
        functools.partial(_layernorm_kernel, eps=eps),
        out_shape=jax.ShapeDtypeStruct((M, D), x.dtype),
        grid=(M // tm,),
        in_specs=[
            pl.BlockSpec((tm, D), lambda i: (i, 0)),
            pl.BlockSpec((1, D), lambda i: (0, 0)),
            pl.BlockSpec((1, D), lambda i: (0, 0)),
        ],
        out_specs=pl.BlockSpec((tm, D), lambda i: (i, 0)),
        compiler_params=pltpu.CompilerParams(
            dimension_semantics=("parallel",)),
    )(x, g2, b2)


# ---------------- fused PreNorm + Linear (fn starts with nn.Linear) ---------

def _prenorm_linear_kernel(x_ref, g_ref, b_ref, w_ref, bias_ref, o_ref,
                           xn_ref, *, eps):
    # Compute LayerNorm once per row tile (first N tile), cache in VMEM scratch.
    @pl.when(pl.program_id(1) == 0)
    def _():
        x = x_ref[...].astype(jnp.float32)                   # (tm, D)
        mu = jnp.mean(x, axis=-1, keepdims=True)
        var = jnp.mean(jnp.square(x - mu), axis=-1, keepdims=True)
        xn = (x - mu) * jax.lax.rsqrt(var + eps) * g_ref[...] + b_ref[...]
        xn_ref[...] = xn.astype(xn_ref.dtype)

    y = jnp.dot(xn_ref[...], w_ref[...],
                preferred_element_type=jnp.float32)          # MXU, f32 acc
    o_ref[...] = (y + bias_ref[...]).astype(o_ref.dtype)     # epilogue in f32


def pallas_prenorm_linear(x, gamma, beta, w, bias=None, eps=1e-5):
    """y = LayerNorm(x) @ w + bias.  x: (M, D), w: (D, N) (bf16), bias: (N,)."""
    M, D = x.shape
    Dw, N = w.shape
    assert D == Dw
    tm = _row_tile(M)
    tn = _col_tile(N)
    if bias is None:
        bias = jnp.zeros((N,), jnp.float32)
    g2 = gamma.reshape(1, D).astype(jnp.float32)
    b2 = beta.reshape(1, D).astype(jnp.float32)
    bias2 = bias.reshape(1, N).astype(jnp.float32)
    return pl.pallas_call(
        functools.partial(_prenorm_linear_kernel, eps=eps),
        out_shape=jax.ShapeDtypeStruct((M, N), jnp.float32),
        grid=(M // tm, N // tn),
        in_specs=[
            pl.BlockSpec((tm, D), lambda i, j: (i, 0)),
            pl.BlockSpec((1, D), lambda i, j: (0, 0)),
            pl.BlockSpec((1, D), lambda i, j: (0, 0)),
            pl.BlockSpec((D, tn), lambda i, j: (0, j)),
            pl.BlockSpec((1, tn), lambda i, j: (0, j)),
        ],
        out_specs=pl.BlockSpec((tm, tn), lambda i, j: (i, j)),
        scratch_shapes=[pltpu.VMEM((tm, D), w.dtype)],
        compiler_params=pltpu.CompilerParams(
            dimension_semantics=("parallel", "arbitrary")),
    )(x, g2, b2, w, bias2)


# ---------------- PreNorm module semantics ----------------------------------

def pre_norm(x, gamma, beta, fn, eps=1e-5):
    """PreNorm.forward: fn(LayerNorm(x)).  fn is any JAX callable on (..., D)."""
    # TODO(synk): fn is an arbitrary wrapped module in the PyTorch spec; it is
    # applied here as plain JAX on the Pallas-LayerNorm output.
    shape = x.shape
    xn = pallas_layernorm(x.reshape(-1, shape[-1]), gamma, beta, eps)
    return fn(xn.reshape(shape))


def pre_norm_linear(x, gamma, beta, w, bias=None, eps=1e-5):
    """PreNorm where fn begins with nn.Linear: fully fused in one Pallas kernel."""
    shape = x.shape
    y = pallas_prenorm_linear(x.reshape(-1, shape[-1]), gamma, beta, w, bias, eps)
    return y.reshape(shape[:-1] + (w.shape[1],))


# ---------------- reference + demo ------------------------------------------

def _ref_prenorm_linear(x, gamma, beta, w, bias, eps=1e-5):
    xf = x.astype(jnp.float32)
    mu = jnp.mean(xf, axis=-1, keepdims=True)
    var = jnp.mean(jnp.square(xf - mu), axis=-1, keepdims=True)
    xn = (xf - mu) * jax.lax.rsqrt(var + eps) * gamma + beta
    return jnp.dot(xn.astype(w.dtype), w,
                   preferred_element_type=jnp.float32) + bias


if __name__ == "__main__":
    key = jax.random.PRNGKey(0)
    kx, kg, kb, kw, kbias = jax.random.split(key, 5)

    B, S, dim, hidden = 2, 8, 32, 64
    x = jax.random.normal(kx, (B, S, dim), jnp.float32)
    gamma = 1.0 + 0.1 * jax.random.normal(kg, (dim,), jnp.float32)
    beta = 0.1 * jax.random.normal(kb, (dim,), jnp.float32)
    # Weights pre-cast to bf16 once (MXU-native input; f32 accumulation in-kernel).
    w = (jax.random.normal(kw, (dim, hidden), jnp.float32)
         / jnp.sqrt(dim)).astype(jnp.bfloat16)
    bias = 0.01 * jax.random.normal(kbias, (hidden,), jnp.float32)

    # Fused PreNorm + Linear path.
    out_fused = pre_norm_linear(x, gamma, beta, w, bias)

    # Generic PreNorm path: Pallas LayerNorm, arbitrary fn applied afterwards.
    fn = lambda xn: jnp.dot(xn.astype(w.dtype), w,
                            preferred_element_type=jnp.float32) + bias
    out_generic = pre_norm(x, gamma, beta, fn)

    ref = _ref_prenorm_linear(x, gamma, beta, w, bias)

    out_fused, out_generic, ref = jax.block_until_ready(
        (out_fused, out_generic, ref))

    assert out_fused.shape == (B, S, hidden), out_fused.shape
    assert out_generic.shape == (B, S, hidden), out_generic.shape
    assert bool(jnp.all(jnp.isfinite(out_fused)))
    assert bool(jnp.all(jnp.isfinite(out_generic)))
    assert bool(jnp.allclose(out_fused, ref, rtol=2e-2, atol=2e-2)), \
        float(jnp.max(jnp.abs(out_fused - ref)))
    assert bool(jnp.allclose(out_generic, ref, rtol=2e-2, atol=2e-2)), \
        float(jnp.max(jnp.abs(out_generic - ref)))
    print("KERNEL_OK")
</pallas_src>

<mosaic_0001>
module attributes {stable_mosaic.version = 11 : i64} {
  func.func @_prenorm_linear_kernel(%arg0: i32, %arg1: i32, %arg2: memref<16x32xf32, #tpu.memory_space<vmem>>, %arg3: memref<1x32xf32, #tpu.memory_space<vmem>>, %arg4: memref<1x32xf32, #tpu.memory_space<vmem>>, %arg5: memref<32x64xbf16, #tpu.memory_space<vmem>>, %arg6: memref<1x64xf32, #tpu.memory_space<vmem>>, %arg7: memref<16x64xf32, #tpu.memory_space<vmem>>, %arg8: memref<16x32xbf16, #tpu.memory_space<vmem>>) attributes {dimension_semantics = [#tpu.dimension_semantics<parallel>, #tpu.dimension_semantics<arbitrary>], iteration_bounds = array<i64: 1, 1>, scalar_prefetch = 0 : i64, scratch_operands = 1 : i64, tpu.core_type = #tpu.core_type<tc>, window_params = [{transform_indices = @transform_0, window_bounds = array<i64: 16, 32>}, {pipeline_mode = #tpu.pipeline_mode<synchronous>, transform_indices = @transform_1, window_bounds = array<i64: 1, 32>}, {pipeline_mode = #tpu.pipeline_mode<synchronous>, transform_indices = @transform_2, window_bounds = array<i64: 1, 32>}, {transform_indices = @transform_3, window_bounds = array<i64: 32, 64>}, {transform_indices = @transform_4, window_bounds = array<i64: 1, 64>}, {transform_indices = @transform_5, window_bounds = array<i64: 16, 64>}]} {
    %c0_i32 = arith.constant 0 : i32
    %0 = arith.cmpi eq, %arg1, %c0_i32 : i32
    %1 = arith.extui %0 : i1 to i32
    %c0_i32_0 = arith.constant 0 : i32
    %2 = arith.cmpi ne, %1, %c0_i32_0 : i32
    scf.if %2 {
      %c0_8 = arith.constant 0 : index
      %c0_9 = arith.constant 0 : index
      %10 = vector.load %arg2[%c0_8, %c0_9] : memref<16x32xf32, #tpu.memory_space<vmem>>, vector<16x32xf32>
      %cst_10 = arith.constant dense<0.000000e+00> : vector<16xf32>
      %11 = vector.multi_reduction <add>, %10, %cst_10 [1] : vector<16x32xf32> to vector<16xf32>
      %12 = vector.shape_cast %11 : vector<16xf32> to vector<16x1xf32>
      %cst_11 = arith.constant 3.200000e+01 : f32
      %13 = vector.broadcast %cst_11 : f32 to vector<16x1xf32>
      %14 = arith.divf %12, %13 : vector<16x1xf32>
      %15 = vector.broadcast %14 : vector<16x1xf32> to vector<16x32xf32>
      %16 = arith.subf %10, %15 : vector<16x32xf32>
      %17 = arith.mulf %16, %16 : vector<16x32xf32>
      %cst_12 = arith.constant dense<0.000000e+00> : vector<16xf32>
      %18 = vector.multi_reduction <add>, %17, %cst_12 [1] : vector<16x32xf32> to vector<16xf32>
      %19 = vector.shape_cast %18 : vector<16xf32> to vector<16x1xf32>
      %cst_13 = arith.constant 3.200000e+01 : f32
      %20 = vector.broadcast %cst_13 : f32 to vector<16x1xf32>
      %21 = arith.divf %19, %20 : vector<16x1xf32>
      %22 = vector.broadcast %14 : vector<16x1xf32> to vector<16x32xf32>
      %23 = arith.subf %10, %22 : vector<16x32xf32>
      %cst_14 = arith.constant 9.99999974E-6 : f32
      %24 = vector.broadcast %cst_14 : f32 to vector<16x1xf32>
      %25 = arith.addf %21, %24 : vector<16x1xf32>
      %26 = math.rsqrt %25 : vector<16x1xf32>
      %27 = vector.broadcast %26 : vector<16x1xf32> to vector<16x32xf32>
      %28 = arith.mulf %23, %27 : vector<16x32xf32>
      %c0_15 = arith.constant 0 : index
      %c0_16 = arith.constant 0 : index
      %29 = vector.load %arg3[%c0_15, %c0_16] : memref<1x32xf32, #tpu.memory_space<vmem>>, vector<1x32xf32>
      %30 = vector.broadcast %29 : vector<1x32xf32> to vector<16x32xf32>
      %31 = arith.mulf %28, %30 : vector<16x32xf32>
      %c0_17 = arith.constant 0 : index
      %c0_18 = arith.constant 0 : index
      %32 = vector.load %arg4[%c0_17, %c0_18] : memref<1x32xf32, #tpu.memory_space<vmem>>, vector<1x32xf32>
      %33 = vector.broadcast %32 : vector<1x32xf32> to vector<16x32xf32>
      %34 = arith.addf %31, %33 : vector<16x32xf32>
      %35 = arith.truncf %34 : vector<16x32xf32> to vector<16x32xbf16>
      %c0_19 = arith.constant 0 : index
      %c0_20 = arith.constant 0 : index
      %36 = vector.load %arg8[%c0_19, %c0_20] : memref<16x32xbf16, #tpu.memory_space<vmem>>, vector<16x32xbf16>
      tpu.vector_store %arg8[%c0_19, %c0_20], %35 {strides = array<i32>} : memref<16x32xbf16, #tpu.memory_space<vmem>>, vector<16x32xbf16>,
    } else {
    }
    %c0 = arith.constant 0 : index
    %c0_1 = arith.constant 0 : index
    %3 = vector.load %arg8[%c0, %c0_1] : memref<16x32xbf16, #tpu.memory_space<vmem>>, vector<16x32xbf16>
    %c0_2 = arith.constant 0 : index
    %c0_3 = arith.constant 0 : index
    %4 = vector.load %arg5[%c0_2, %c0_3] : memref<32x64xbf16, #tpu.memory_space<vmem>>, vector<32x64xbf16>
    %cst = arith.constant dense<0.000000e+00> : vector<16x64xf32>
    %5 = tpu.matmul %3, %4, %cst {dimension_numbers = #tpu.dot_dimension_numbers<[1], [0], [0], [1], [0, 0, 1, 1], [], []>} : vector<16x32xbf16>, vector<32x64xbf16>, vector<16x64xf32> -> vector<16x64xf32>
    %c0_4 = arith.constant 0 : index
    %c0_5 = arith.constant 0 : index
    %6 = vector.load %arg6[%c0_4, %c0_5] : memref<1x64xf32, #tpu.memory_space<vmem>>, vector<1x64xf32>
    %7 = vector.broadcast %6 : vector<1x64xf32> to vector<16x64xf32>
    %8 = arith.addf %5, %7 : vector<16x64xf32>
    %c0_6 = arith.constant 0 : index
    %c0_7 = arith.constant 0 : index
    %9 = vector.load %arg7[%c0_6, %c0_7] : memref<16x64xf32, #tpu.memory_space<vmem>>, vector<16x64xf32>
    tpu.vector_store %arg7[%c0_6, %c0_7], %8 {strides = array<i32>} : memref<16x64xf32, #tpu.memory_space<vmem>>, vector<16x64xf32>,
    return
  }
  func.func @transform_0(%arg0: i32, %arg1: i32) -> (i32, i32) {
    %c0_i32 = arith.constant 0 : i32
    %c0_i32_0 = arith.constant 0 : i32
    return %arg0, %c0_i32 : i32, i32
  }
  func.func @transform_1(%arg0: i32, %arg1: i32) -> (i32, i32) {
    %c0_i32 = arith.constant 0 : i32
    %c0_i32_0 = arith.constant 0 : i32
    %c0_i32_1 = arith.constant 0 : i32
    return %c0_i32, %c0_i32_0 : i32, i32
  }
  func.func @transform_2(%arg0: i32, %arg1: i32) -> (i32, i32) {
    %c0_i32 = arith.constant 0 : i32
    %c0_i32_0 = arith.constant 0 : i32
    %c0_i32_1 = arith.constant 0 : i32
    return %c0_i32, %c0_i32_0 : i32, i32
  }
  func.func @transform_3(%arg0: i32, %arg1: i32) -> (i32, i32) {
    %c0_i32 = arith.constant 0 : i32
    %c0_i32_0 = arith.constant 0 : i32
    return %c0_i32, %arg1 : i32, i32
  }
  func.func @transform_4(%arg0: i32, %arg1: i32) -> (i32, i32) {
    %c0_i32 = arith.constant 0 : i32
    %c0_i32_0 = arith.constant 0 : i32
    return %c0_i32, %arg1 : i32, i32
  }
  func.func @transform_5(%arg0: i32, %arg1: i32) -> (i32, i32) {
    %c0_i32 = arith.constant 0 : i32
    return %arg0, %arg1 : i32, i32
  }
}

</mosaic_0001>

<bundles_post_ra>
// kernel: tpu_custom_call.1
= control target key start
LH: loop header
LB: loop body
LE: loop exit
PB: predicated region body
PF: predicated region fallthrough
CT: control target
= control target key end

     0   :  { %10 = vsyncpa [#allocation4], 0  ;;  %s394_s0 = inlined_call_operand.hbm [shape: f32[16,32], index: 0, kind: input, shape index: {}]   ;;  %s395_s1 = inlined_call_operand.vmem [shape: f32[1,32], index: 1, kind: input, shape index: {}]   ;;  %s396_s2 = inlined_call_operand.vmem [shape: f32[1,32], index: 2, kind: input, shape index: {}]   ;;  %s397_s3 = inlined_call_operand.hbm [shape: bf16[32,64], index: 3, kind: input, shape index: {}]   ;;  %s398_s4 = inlined_call_operand.vmem [shape: f32[1,64], index: 4, kind: input, shape index: {}]   ;;  %s399_s5 = inlined_call_operand.hbm [shape: f32[16,64], index: 5, kind: output, shape index: {}]  }
   0x1   :  { %11 = vsyncpa [#allocation7], 0 }
   0x2   :  { %12 = vsyncpa [#allocation5], 0  ;;  %s298_s18 = smov [#allocation3]   ;;  %s226_s22 = scalar_lea.hbm %s394_s0, 256 }
   0x3   :  { %s18_s19 = sshll.u32 %s298_s18, 4  ;;  %p227_p0 = scmp.ne.s32.totalorder %s394_s0, %s226_s22  ;;  %s19_s19 = int_to_ptr.vmem [resolvable:$true] %s18_s19 }
   0x4   :  { %p230_p1 = scmp.lt.u32.totalorder %s226_s22, %s394_s0 }
   0x6   :  { %p232_p2 = pnand %p230_p1, %p227_p0 }
   0x8   :  { %235 = shalt.err (!%p232_p2)
}
   0x9   :  { %s236_s27 = scalar_lea.vmem %s19_s19, 256  ;;  %p241_p4 = scmp.lt.s32.totalorder %s19_s19, %s19_s19 }
   0xa   :  { %p237_p3 = scmp.ne.s32.totalorder %s19_s19, %s236_s27  ;;  %p242_p5 = scmp.lt.s32.totalorder %s236_s27, %s236_s27 }
   0xc   :  { %p243_p6 = por %p242_p5, %p241_p4 }
   0xe   :  { %p244_p7 = pnand %p243_p6, %p237_p3 }
  0x10   :  { %247 = shalt.err (!%p244_p7)
}
  0x11   :  { %s299_s28 = smov 128   ;;  %s300_s29 = smov 8  }
  0x12   :  { %24 = dma.hbm_to_vmem [thread:$0]  %s394_s0, 256, %s19_s19, [#allocation4], %s299_s28, %s299_s28, %s300_s29  }
  0x13   :  { %s301_s7 = smov [#allocation6]   ;;  %s248_s11 = scalar_lea.hbm %s397_s3, 256 }
  0x14   :  { %s34_s8 = sshll.u32 %s301_s7, 4  ;;  %p249_p8 = scmp.ne.s32.totalorder %s397_s3, %s248_s11  ;;  %s35_s8 = int_to_ptr.vmem [resolvable:$true] %s34_s8 }
  0x15   :  { %p252_p9 = scmp.lt.u32.totalorder %s248_s11, %s397_s3 }
  0x17   :  { %p254_p10 = pnand %p252_p9, %p249_p8 }
  0x19   :  { %257 = shalt.err (!%p254_p10)
}
  0x1a   :  { %s258_s16 = scalar_lea.vmem %s35_s8, 256  ;;  %p263_p12 = scmp.lt.s32.totalorder %s35_s8, %s35_s8 }
  0x1b   :  { %p259_p11 = scmp.ne.s32.totalorder %s35_s8, %s258_s16  ;;  %p264_p13 = scmp.lt.s32.totalorder %s258_s16, %s258_s16 }
  0x1d   :  { %p265_p0 = por %p264_p13, %p263_p12 }
  0x1f   :  { %p266_p1 = pnand %p265_p0, %p259_p11 }
  0x21   :  { %269 = shalt.err (!%p266_p1)
}
  0x22   :  { %s302_s0 = smov 64   ;;  %s303_s17 = smov 4  }
  0x23   :  { %40 = dma.hbm_to_vmem [thread:$0]  %s397_s3, 256, %s35_s8, [#allocation7], %s302_s0, %s302_s0, %s303_s17  }
  0x24   :  { %292 = dma.done.wait [#allocation4], 256  }
  0x25   :  { %293 = vsyncadd [#allocation4], 4294967040 }
  0x26   :  { %294 = dma.done.wait [#allocation7], 256  }
  0x27   :  { %295 = vsyncadd [#allocation7], 4294967040  ;;  %vm56_vm0 = vcmask 261120   ;;  %v54_v0 = vld [vmem:[#allocation3] sm:$0xff]  ;;  %v55_v1 = vld [vmem:[#allocation3 + $0x8] sm:$0xff]  ;;  %v304_v15 = vmov 0.0  }
  0x28   :  { %v57_v2 = vsel %vm56_vm0, %v54_v0, 0.0  ;;  %v60_v3 = vsel %vm56_vm0, %v55_v1, 0.0  ;;  %v220_v14 = vld [vmem:[#allocation6] sm:$0xff]   ;;  %203 = vmatprep.subr.bf16.mxu0 %v304_v15  ;;  %v221_v16 = vld [vmem:[#allocation6 + $0x8] sm:$0xff]   ;;  %vm305_vm1 = vmmov 0   ;;  %vm173_vm2 = vcmask 523264  }
  0x29   :  { %58 = vadd.xlane.f32.xlu0 %v57_v2  ;;  %204 = vmatpush3.bf16.msra.mxu0 %v220_v14  ;;  %v194_v25 = vld [vmem:[%s395_s1] ss:$0 sm:$0xff]  ;;  %s306_s1 = smov [#allocation8]  }
  0x2a   :  { %207 = vmatprep.mubr.msk.bf16.mxu0 %vm305_vm1, %v304_v15  ;;  %205 = vmatprep.subr.bf16.mxu0 %v304_v15  ;;  %v195_v29 = vld [vmem:[%s396_s2] ss:$0 sm:$0xff]  ;;  %s181_s25 = sshll.u32 %s306_s1, 4  ;;  %s182_s25 = int_to_ptr.vmem [resolvable:$true] %s181_s25 }
  0x2b   :  { %v196_v35 = vld [vmem:[%s398_s4] ss:$0 sm:$0xff]  ;;  %s270_s2 = scalar_lea.vmem %s182_s25, 256  ;;  %p275_p3 = scmp.lt.s32.totalorder %s182_s25, %s182_s25 }
  0x2c   :  { %p271_p2 = scmp.ne.s32.totalorder %s182_s25, %s270_s2  ;;  %p276_p4 = scmp.lt.s32.totalorder %s270_s2, %s270_s2 }
  0x2d   :  { %61 = vadd.xlane.f32.xlu0 %v60_v3  ;;  %206 = vmatpush3.bf16.msra.mxu0 %v221_v16 }
  0x2e   :  { %p277_p5 = por %p276_p4, %p275_p3 }
  0x30   :  { %p278_p6 = pnand %p277_p5, %p271_p2 }
  0xb6   :  { %v59_v4 = vpop.xlane.xlu0 %58 }
  0xb7   :  { %v64_v5 = vmul.f32 0.03125, %v59_v4 }
  0xb9   :  { %v66_v6 = vsub.f32 %v54_v0, %v64_v5 }
  0xba   :  { %v62_v7 = vpop.xlane.xlu0 %61 }
  0xbb   :  { %v65_v8 = vmul.f32 0.03125, %v62_v7  ;;  %v68_v9 = vmul.f32 %v66_v6, %v66_v6 }
  0xbd   :  { %v67_v10 = vsub.f32 %v55_v1, %v65_v8  ;;  %v70_v11 = vsel %vm56_vm0, %v68_v9, 0.0 }
  0xbe   :  { %71 = vadd.xlane.f32.xlu1 %v70_v11 }
  0xbf   :  { %v69_v12 = vmul.f32 %v67_v10, %v67_v10 }
  0xc1   :  { %v73_v13 = vsel %vm56_vm0, %v69_v12, 0.0 }
  0xc2   :  { %74 = vadd.xlane.f32.xlu1 %v73_v13 }
 0x14b   :  { %v72_v17 = vpop.xlane.xlu1 %71 }
 0x14c   :  { %v76_v18 = vmul.f32 0.03125, %v72_v17 }
 0x14e   :  { %v78_v19 = vadd.f32 1e-05, %v76_v18 }
 0x14f   :  { %v75_v20 = vpop.xlane.xlu1 %74 }
 0x150   :  { %222 = vrsqrt.f32 %v78_v19  ;;  %v77_v21 = vmul.f32 0.03125, %v75_v20 }
 0x152   :  { %v79_v22 = vadd.f32 1e-05, %v77_v21 }
 0x154   :  { %224 = vrsqrt.f32 %v79_v22 }
 0x15a   :  { %v223_v23 = vpop.eup %222 }
 0x15b   :  { %v82_v24 = vmul.f32 %v223_v23, %v66_v6 }
 0x15d   :  { %v91_v27 = vmul.f32 %v194_v25, %v82_v24 }
 0x15e   :  { %v225_v26 = vpop.eup %224 }
 0x15f   :  { %v83_v28 = vmul.f32 %v225_v26, %v67_v10  ;;  %v100_v31 = vadd.f32 %v195_v29, %v91_v27 }
 0x161   :  { %v92_v30 = vmul.f32 %v194_v25, %v83_v28 }
 0x163   :  { %v101_v32 = vadd.f32 %v195_v29, %v92_v30 }
 0x165   :  { %v102_v33 = vpack.c.bf16 %v101_v32, %v100_v31 }
 0x167   :  { %103 = vst.msk [vmem:[#allocation2] sm:$0xff] %vm56_vm0, %v102_v33 }
 0x16e   :  { %v104_v34 = vld [vmem:[#allocation2] sm:$0xff] }
 0x16f   :  { %208 = vmatmul.mubr.msk.bf16.vlgmr.msra.gmra.mrb[0].mxu0 %vm56_vm0, %v104_v34 }
 0x242   :  { %v166_v36 = vpop.f32.mrb[0].mxu0 }
 0x243   :  { %v167_v37 = vadd.f32 %v196_v35, %v166_v36  ;;  %v209_v38 = vpop.f32.mrb[1].mxu0 }
 0x244   :  { %v169_v39 = vpop.f32.mrb[2].mxu0 }
 0x245   :  { %v170_v40 = vadd.f32 %v196_v35, %v169_v39  ;;  %v210_v41 = vpop.f32.mrb[3].mxu0  ;;  %174 = vst.msk [vmem:[#allocation8] sm:$0xff] %vm173_vm2, %v167_v37 }
 0x247   :  { %175 = vst.msk [vmem:[#allocation8 + $0x8] sm:$0xff] %vm173_vm2, %v170_v40 }
 0x248   :  { %281 = shalt.err (!%p278_p6)
}
 0x249   :  { %s282_s27 = scalar_lea.hbm %s399_s5, 256 }
 0x24a   :  { %p283_p7 = scmp.ne.s32.totalorder %s399_s5, %s282_s27  ;;  %p286_p8 = scmp.lt.u32.totalorder %s282_s27, %s399_s5 }
 0x24c   :  { %p288_p9 = pnand %p286_p8, %p283_p7 }
 0x24e   :  { %291 = shalt.err (!%p288_p9)
}
 0x24f   :  { %187 = dma.vmem_to_hbm [thread:$0]  %s182_s25, 256, %s399_s5, [#allocation5], %s299_s28, %s299_s28, %s300_s29  }
 0x250   :  { %296 = dma.done.wait [#allocation5], 256  }
 0x251   :  { %297 = vsyncadd [#allocation5], 4294967040 }
 0x252   :  { %191 = vsyncpa [#allocation4], 1 }
 0x253   :  { %192 = vsyncpa [#allocation7], 1 }
 0x254   :  { %193 = vsyncpa [#allocation5], 1 }

</bundles_post_ra>
